<compile_context>
chip_gen: v5e
topology: v5e:2x2
jax: 0.10.0
libtpu: 0.0.40
codegen_flags: <defaults>
</compile_context>

<pallas_src>
import functools

import jax
import jax.numpy as jnp
from jax.experimental import pallas as pl
from jax.experimental.pallas import tpu as pltpu


def _round_up(n, m):
    return ((n + m - 1) // m) * m


def fnet_kernel(x_ref, w1_ref, b1_ref, w2_ref, b2_ref, o_ref):
    # fc1: (TB, D_in) @ (D_in, H) with f32 MXU accumulation. x is cast to the
    # weight compute dtype per tile (no-op if already bf16 from the pad path).
    h = jnp.dot(x_ref[...].astype(w1_ref.dtype), w1_ref[...],
                preferred_element_type=jnp.float32)
    h = h + b1_ref[...]                       # bias add in f32
    h = jnp.maximum(h, 0.2 * h)               # LeakyReLU(0.2): single max (VPU)
    # fc2: (TB, H) @ (H, D_out) with f32 MXU accumulation.
    out = jnp.dot(h.astype(w2_ref.dtype), w2_ref[...],
                  preferred_element_type=jnp.float32)
    o_ref[...] = (out + b2_ref[...]).astype(o_ref.dtype)   # lane-dense store


def _resident_spec(shape):
    """Weight-stationary block: constant index_map, single-buffered when supported."""
    idx = lambda i: (0,) * len(shape)
    if hasattr(pl, "Buffered"):
        try:
            return pl.BlockSpec(shape, idx, pipeline_mode=pl.Buffered(1))
        except TypeError:
            pass  # older jax without pipeline_mode kwarg
    return pl.BlockSpec(shape, idx)


@functools.partial(jax.jit, static_argnames=("tb", "d_out"))
def _fnet_forward_pallas(x, w1_p, b1_p, w2_p, b2_p, *, tb, d_out):
    B, d_in = x.shape
    D_in_p, H_p = w1_p.shape
    D_out_p = w2_p.shape[1]
    out_dtype = x.dtype
    B_p = _round_up(B, tb)

    if B_p != B or D_in_p != d_in:
        # Single fused pad+cast op; only taken when the input isn't lane-aligned.
        x_in = (jnp.zeros((B_p, D_in_p), w1_p.dtype)
                .at[:B, :d_in].set(x.astype(w1_p.dtype)))
    else:
        x_in = x  # already aligned: stream f32 directly, cast per tile in-kernel

    grid = (B_p // tb,)

    # VMEM budget: single-buffered resident weights + double-buffered x/out tiles
    # + f32/bf16 intermediates, with ~50% headroom; kept under v7x's 64 MiB.
    wbytes = jnp.dtype(w1_p.dtype).itemsize
    vmem = ((D_in_p * H_p + H_p * D_out_p) * wbytes + (H_p + D_out_p) * 4
            + 2 * tb * D_in_p * jnp.dtype(x_in.dtype).itemsize
            + 2 * tb * D_out_p * jnp.dtype(out_dtype).itemsize
            + tb * H_p * (4 + wbytes) + tb * D_out_p * 4)
    vmem = int(min(max(int(vmem * 1.5) + (1 << 20), 4 << 20), 60 << 20))

    out_p = pl.pallas_call(
        fnet_kernel,
        out_shape=jax.ShapeDtypeStruct((B_p, D_out_p), out_dtype),
        grid=grid,
        in_specs=[
            # Streamed activations: one batch tile per grid step (double-buffered).
            pl.BlockSpec((tb, D_in_p), lambda i: (i, 0)),
            # Weight-stationary, single-buffered (constant block index).
            _resident_spec((D_in_p, H_p)),
            _resident_spec((1, H_p)),
            _resident_spec((H_p, D_out_p)),
            _resident_spec((1, D_out_p)),
        ],
        out_specs=pl.BlockSpec((tb, D_out_p), lambda i: (i, 0)),
        compiler_params=pltpu.CompilerParams(
            dimension_semantics=("parallel",),   # shards batch across v7x's 2 TCs
            vmem_limit_bytes=vmem,
        ),
    )(x_in, w1_p, b1_p, w2_p, b2_p)

    if B_p != B or D_out_p != d_out:
        out_p = out_p[:B, :d_out]
    return out_p


def fnet_prepare_params(w1, b1, w2, b2, compute_dtype=jnp.bfloat16):
    """Pad feature dims to 128-multiples and cast weights to the MXU compute dtype
    ONCE (cache the result) so the per-call path never re-pads weights in HBM."""
    D_in, H = w1.shape
    D_out = w2.shape[1]
    D_in_p, H_p, D_out_p = (_round_up(d, 128) for d in (D_in, H, D_out))
    cd = compute_dtype
    b1 = b1.reshape(1, -1)
    b2 = b2.reshape(1, -1)

    def pad2(a, shape, dtype):
        a = a.astype(dtype)
        if a.shape == shape:
            return a
        return jnp.zeros(shape, dtype).at[:a.shape[0], :a.shape[1]].set(a)

    return {
        "dims": (D_in, H, D_out),
        "w1": w1, "b1": b1, "w2": w2, "b2": b2,
        "w1_p": pad2(w1, (D_in_p, H_p), cd),
        "b1_p": pad2(b1, (1, H_p), jnp.float32),
        "w2_p": pad2(w2, (H_p, D_out_p), cd),
        "b2_p": pad2(b2, (1, D_out_p), jnp.float32),
    }


def fnet_forward(x, params, *, block_b=512, force_pallas=False):
    """x: (B, D_in) -> (B, D_out). Pallas path for big problems, jnp for tiny ones."""
    B = x.shape[0]
    d_in, hdim, d_out = params["dims"]

    # Small-problem fallback: padding inflation + launch overhead dominate.
    if not force_pallas and (B < 256 or max(d_in, hdim, d_out) < 128):
        h = x @ params["w1"] + params["b1"]
        h = jnp.maximum(h, 0.2 * h)
        return h @ params["w2"] + params["b2"]

    tb = min(block_b, _round_up(B, 128))
    tb = max(128, (tb // 128) * 128)          # keep the batch tile 128-row aligned
    if B > 128 and (_round_up(B, tb) // tb) < 2:
        # Give the 'parallel' batch axis >=2 steps so both v7x TCs get work.
        tb = max(128, ((_round_up(B, 128) // 2) // 128) * 128)

    return _fnet_forward_pallas(
        x, params["w1_p"], params["b1_p"], params["w2_p"], params["b2_p"],
        tb=tb, d_out=d_out)


def init_fnet_params(key, input_dim, hidden_dim, output_dim, dtype=jnp.float32):
    """xavier_normal_ weights, zero biases (matches weight_init in the PyTorch spec)."""
    k1, k2 = jax.random.split(key)
    std1 = (2.0 / (input_dim + hidden_dim)) ** 0.5
    std2 = (2.0 / (hidden_dim + output_dim)) ** 0.5
    # PyTorch stores (out, in); we store transposed (in, out) for x @ W.
    w1 = (jax.random.normal(k1, (input_dim, hidden_dim)) * std1).astype(dtype)
    b1 = jnp.zeros((1, hidden_dim), dtype)
    w2 = (jax.random.normal(k2, (hidden_dim, output_dim)) * std2).astype(dtype)
    b2 = jnp.zeros((1, output_dim), dtype)
    return w1, b1, w2, b2


def _check_case(key, B, D_in, H, D_out, *, force_pallas):
    kx, kp = jax.random.split(key)
    x = jax.random.normal(kx, (B, D_in), dtype=jnp.float32)
    w1, b1, w2, b2 = init_fnet_params(kp, D_in, H, D_out)
    params = fnet_prepare_params(w1, b1, w2, b2)

    out = fnet_forward(x, params, force_pallas=force_pallas)
    out = jax.block_until_ready(out)
    assert out.shape == (B, D_out)
    assert out.dtype == x.dtype

    # Full-f32 module reference (loose tolerance covers bf16 matmul operands).
    hf = x @ w1 + b1
    hf = jnp.maximum(hf, 0.2 * hf)
    ref_f32 = hf @ w2 + b2
    assert jnp.allclose(out, ref_f32, atol=5e-2, rtol=5e-2), (
        float(jnp.max(jnp.abs(out - ref_f32))))

    if force_pallas:
        # Tighter check vs matching bf16-operand / f32-accumulation math.
        bf = jnp.bfloat16
        h = jnp.dot(x.astype(bf), w1.astype(bf), preferred_element_type=jnp.float32)
        h = h + b1.astype(jnp.float32)
        h = jnp.maximum(h, 0.2 * h)
        ref = jnp.dot(h.astype(bf), w2.astype(bf), preferred_element_type=jnp.float32)
        ref = (ref + b2.astype(jnp.float32)).astype(x.dtype)
        assert jnp.allclose(out, ref, atol=5e-3, rtol=5e-3), (
            float(jnp.max(jnp.abs(out - ref))))


if __name__ == "__main__":
    key = jax.random.PRNGKey(0)
    k1, k2, k3 = jax.random.split(key, 3)

    # 1) Tiny, spec-like shapes -> auto small-problem fallback (plain jnp path).
    _check_case(k1, B=8, D_in=16, H=32, D_out=8, force_pallas=False)

    # 2) Lane-aligned shapes -> Pallas kernel, no padding, >=2 grid steps.
    _check_case(k2, B=512, D_in=128, H=256, D_out=128, force_pallas=True)

    # 3) Unaligned shapes -> Pallas kernel via the pad/slice path.
    _check_case(k3, B=200, D_in=96, H=160, D_out=72, force_pallas=True)

    print("KERNEL_OK")
</pallas_src>

<mosaic_0001>
module attributes {stable_mosaic.version = 11 : i64} {
  func.func @fnet_kernel(%arg0: i32, %arg1: memref<256x128xf32, #tpu.memory_space<vmem>>, %arg2: memref<128x256xbf16, #tpu.memory_space<vmem>>, %arg3: memref<1x256xf32, #tpu.memory_space<vmem>>, %arg4: memref<256x128xbf16, #tpu.memory_space<vmem>>, %arg5: memref<1x128xf32, #tpu.memory_space<vmem>>, %arg6: memref<256x128xf32, #tpu.memory_space<vmem>>) attributes {dimension_semantics = [#tpu.dimension_semantics<parallel>], iteration_bounds = array<i64: 2>, scalar_prefetch = 0 : i64, scratch_operands = 0 : i64, tpu.core_type = #tpu.core_type<tc>, window_params = [{transform_indices = @transform_0, window_bounds = array<i64: 256, 128>}, {pipeline_mode = #tpu.pipeline_mode<synchronous>, transform_indices = @transform_1, window_bounds = array<i64: 128, 256>}, {pipeline_mode = #tpu.pipeline_mode<synchronous>, transform_indices = @transform_2, window_bounds = array<i64: 1, 256>}, {pipeline_mode = #tpu.pipeline_mode<synchronous>, transform_indices = @transform_3, window_bounds = array<i64: 256, 128>}, {pipeline_mode = #tpu.pipeline_mode<synchronous>, transform_indices = @transform_4, window_bounds = array<i64: 1, 128>}, {transform_indices = @transform_5, window_bounds = array<i64: 256, 128>}]} {
    %c0 = arith.constant 0 : index
    %c0_0 = arith.constant 0 : index
    %0 = vector.load %arg1[%c0, %c0_0] : memref<256x128xf32, #tpu.memory_space<vmem>>, vector<256x128xf32>
    %1 = arith.truncf %0 : vector<256x128xf32> to vector<256x128xbf16>
    %c0_1 = arith.constant 0 : index
    %c0_2 = arith.constant 0 : index
    %2 = vector.load %arg2[%c0_1, %c0_2] : memref<128x256xbf16, #tpu.memory_space<vmem>>, vector<128x256xbf16>
    %cst = arith.constant dense<0.000000e+00> : vector<256x256xf32>
    %3 = tpu.matmul %1, %2, %cst {dimension_numbers = #tpu.dot_dimension_numbers<[1], [0], [0], [1], [0, 0, 1, 1], [], []>} : vector<256x128xbf16>, vector<128x256xbf16>, vector<256x256xf32> -> vector<256x256xf32>
    %c0_3 = arith.constant 0 : index
    %c0_4 = arith.constant 0 : index
    %4 = vector.load %arg3[%c0_3, %c0_4] : memref<1x256xf32, #tpu.memory_space<vmem>>, vector<1x256xf32>
    %5 = vector.broadcast %4 : vector<1x256xf32> to vector<256x256xf32>
    %6 = arith.addf %3, %5 : vector<256x256xf32>
    %cst_5 = arith.constant 2.000000e-01 : f32
    %7 = vector.broadcast %cst_5 : f32 to vector<256x256xf32>
    %8 = arith.mulf %7, %6 : vector<256x256xf32>
    %9 = arith.maximumf %6, %8 : vector<256x256xf32>
    %10 = arith.truncf %9 : vector<256x256xf32> to vector<256x256xbf16>
    %c0_6 = arith.constant 0 : index
    %c0_7 = arith.constant 0 : index
    %11 = vector.load %arg4[%c0_6, %c0_7] : memref<256x128xbf16, #tpu.memory_space<vmem>>, vector<256x128xbf16>
    %cst_8 = arith.constant dense<0.000000e+00> : vector<256x128xf32>
    %12 = tpu.matmul %10, %11, %cst_8 {dimension_numbers = #tpu.dot_dimension_numbers<[1], [0], [0], [1], [0, 0, 1, 1], [], []>} : vector<256x256xbf16>, vector<256x128xbf16>, vector<256x128xf32> -> vector<256x128xf32>
    %c0_9 = arith.constant 0 : index
    %c0_10 = arith.constant 0 : index
    %13 = vector.load %arg5[%c0_9, %c0_10] : memref<1x128xf32, #tpu.memory_space<vmem>>, vector<1x128xf32>
    %14 = vector.broadcast %13 : vector<1x128xf32> to vector<256x128xf32>
    %15 = arith.addf %12, %14 : vector<256x128xf32>
    %c0_11 = arith.constant 0 : index
    %c0_12 = arith.constant 0 : index
    %16 = vector.load %arg6[%c0_11, %c0_12] : memref<256x128xf32, #tpu.memory_space<vmem>>, vector<256x128xf32>
    tpu.vector_store %arg6[%c0_11, %c0_12], %15 {strides = array<i32>} : memref<256x128xf32, #tpu.memory_space<vmem>>, vector<256x128xf32>,
    return
  }
  func.func @transform_0(%arg0: i32) -> (i32, i32) {
    %c0_i32 = arith.constant 0 : i32
    %c0_i32_0 = arith.constant 0 : i32
    return %arg0, %c0_i32 : i32, i32
  }
  func.func @transform_1(%arg0: i32) -> (i32, i32) {
    %c0_i32 = arith.constant 0 : i32
    %c0_i32_0 = arith.constant 0 : i32
    %c0_i32_1 = arith.constant 0 : i32
    return %c0_i32, %c0_i32_0 : i32, i32
  }
  func.func @transform_2(%arg0: i32) -> (i32, i32) {
    %c0_i32 = arith.constant 0 : i32
    %c0_i32_0 = arith.constant 0 : i32
    %c0_i32_1 = arith.constant 0 : i32
    return %c0_i32, %c0_i32_0 : i32, i32
  }
  func.func @transform_3(%arg0: i32) -> (i32, i32) {
    %c0_i32 = arith.constant 0 : i32
    %c0_i32_0 = arith.constant 0 : i32
    %c0_i32_1 = arith.constant 0 : i32
    return %c0_i32, %c0_i32_0 : i32, i32
  }
  func.func @transform_4(%arg0: i32) -> (i32, i32) {
    %c0_i32 = arith.constant 0 : i32
    %c0_i32_0 = arith.constant 0 : i32
    %c0_i32_1 = arith.constant 0 : i32
    return %c0_i32, %c0_i32_0 : i32, i32
  }
  func.func @transform_5(%arg0: i32) -> (i32, i32) {
    %c0_i32 = arith.constant 0 : i32
    %c0_i32_0 = arith.constant 0 : i32
    return %arg0, %c0_i32 : i32, i32
  }
}

</mosaic_0001>

<bundles_post_ra>
// kernel: _fnet_forward_pallas.1
= control target key start
LH: loop header
LB: loop body
LE: loop exit
PB: predicated region body
PF: predicated region fallthrough
CT: control target
= control target key end

     0   :  { %10 = vsyncpa [#allocation3], 0  ;;  %s2086_s0 = inlined_call_operand.hbm [shape: f32[512,128], index: 0, kind: input, shape index: {}]   ;;  %s2087_s1 = inlined_call_operand.hbm [shape: bf16[128,256], index: 1, kind: input, shape index: {}]   ;;  %s2088_s2 = inlined_call_operand.hbm [shape: f32[1,256], index: 2, kind: input, shape index: {}]   ;;  %s2089_s3 = inlined_call_operand.hbm [shape: bf16[256,128], index: 3, kind: input, shape index: {}]   ;;  %s2090_s4 = inlined_call_operand.vmem [shape: f32[1,128], index: 4, kind: input, shape index: {}]   ;;  %s2091_s5 = inlined_call_operand.hbm [shape: f32[512,128], index: 5, kind: output, shape index: {}]  }
   0x1   :  { %12 = vsyncpa [#allocation3 + $0x1], 0 }
   0x2   :  { %13 = vsyncpa [#allocation6], 0 }
   0x3   :  { %14 = vsyncpa [#allocation9], 0 }
   0x4   :  { %15 = vsyncpa [#allocation4], 0 }
   0x5   :  { %17 = vsyncpa [#allocation4 + $0x1], 0  ;;  %s1744_s18 = smov 0   ;;  %s1746_s19 = smov 0  }
   0x6   :  { %s1748_s20 = smov 0   ;;  %s1750_s21 = smov 0  }
   0x7 LB: > { %s1765_s22 = sadd.s32 4294967295, %s1703_s21   ;;  %s1243_s23 = sadd.s32 4294967294, %s1703_s21   ;;  %s1703_s21 = sphi %s1750_s21, %s2104_s21   ;;  %s1699_s20 = sphi %s1748_s20, %s2103_s20   ;;  %s1695_s19 = sphi %s1746_s19, %s2102_s19   ;;  %s1691_s18 = sphi %s1744_s18, %s2101_s18  }
   0x8   : > { %p43_p0 = scmp.ne.s32.totalorder %s1695_s19, %s1691_s18  ;;  %p44_p1 = scmp.eq.s32.totalorder %s1765_s22, 0 }
   0x9   : > { %p151_p2 = scmp.eq.s32.totalorder %s1765_s22, 1  ;;  %p157_p3 = scmp.eq.s32.totalorder %s1243_s23, 1 }
   0xa   : > { %p1774_p4 = por %p44_p1, %p43_p0  ;;  %p1244_p5 = scmp.ge.s32.totalorder %s1703_s21, 1 }
   0xb   : > { %p1779_p6 = por %p157_p3, %p43_p0  ;;  %p164_p7 = scmp.lt.s32.totalorder %s1703_s21, 3 }
   0xc   : > { %s175_s28 = sshll.u32 %s2087_s1, 4  ;;  %s1705_s30 = smov [#allocation5]   ;;  %s176_s28 = int_to_ptr.hbm [resolvable:$true] %s175_s28 }
   0xd   : > { %p1787_p8 = pnand %p1244_p5, %p164_p7  ;;  %s177_s6 = sshll.u32 %s1705_s30, 4  ;;  %s178_s6 = int_to_ptr.vmem [resolvable:$true] %s177_s6 }
   0xe   : > { %s190_s10 = sshll.u32 %s2088_s2, 4  ;;  %s2092_s11 = smov 128   ;;  %s191_s10 = int_to_ptr.hbm [resolvable:$true] %s190_s10 }
   0xf   : > { %p1441_p9 = pneg %p1787_p8  ;;  %s1707_s12 = smov 8  }
  0x10   : > { %s1708_s13 = smov [#allocation7]   ;;  %s201_s17 = sshll.u32 %s2089_s3, 4  ;;  %s202_s17 = int_to_ptr.hbm [resolvable:$true] %s201_s17 }
  0x11   : > { %p1795_p10 = pnand %p1441_p9, %p44_p1  ;;  %s192_s14 = sshll.u32 %s1708_s13, 4  ;;  %s193_s14 = int_to_ptr.vmem [resolvable:$true] %s192_s14 }
  0x12   : > { %s1709_s23 = smov [#allocation8]   ;;  %s1710_s27 = smov 64  }
  0x13   : > { %1444 = dma.hbm_to_vmem [thread:$0]  (!%p1795_p10), %s176_s28, 2048, %s178_s6, [#allocation6], %s2092_s11, %s2092_s11, %s1707_s12  }
  0x14   : > { %1447 = dma.hbm_to_vmem [thread:$0]  (!%p1795_p10), %s191_s10, 32, %s193_s14, [#allocation6]  }
  0x15   : > { %s203_s26 = sshll.u32 %s1709_s23, 4  ;;  %s1711_s28 = smov 4   ;;  %s204_s26 = int_to_ptr.vmem [resolvable:$true] %s203_s26 }
  0x16   : > { %1450 = dma.hbm_to_vmem [thread:$0]  (!%p1795_p10), %s202_s17, 2048, %s204_s26, [#allocation9], %s1710_s27, %s1710_s27, %s1711_s28  }
  0x17   : > { %s1816_s30 = sadd.s32 1, %s1703_s21   ;;  %s30_s8 = sadd.s32 1, %s1699_s20 }
  0x18   : > { %s27_s6 = ssub.s32 %s1703_s21, %s1816_s30  ;;  %p37_p13 = scmp.ne.s32.totalorder %s1699_s20, %s1695_s19 }
  0x19   : > { %p28_p12 = scmp.eq.s32.totalorder %s27_s6, 0  ;;  %p38_p0 = scmp.eq.s32.totalorder %s1703_s21, 0 }
  0x1a   : > { %p1829_p3 = por %p151_p2, %p37_p13  ;;  %p1462_p5 = scmp.lt.s32.totalorder %s1703_s21, 2 }
  0x1b   : > { %s1825_s9 = scalar_select %p28_p12, %s1699_s20, %s30_s8  }
  0x1c   : > { %s220_s13 = sand.u32 1, %s1699_s20   ;;  %s1391_s14 = sshll.u32 %s1703_s21, 8 }
  0x1d   : > { %p39_p7 = por %p38_p0, %p37_p13  ;;  %s1249_s7 = sshll.u32 %s220_s13, 8 }
  0x1e   : > { %s229_s17 = scalar_lea.hbm %s2086_s0, %s1391_s14  ;;  %s224_s26 = scalar_lea.vmem [#allocation2], %s1249_s7 }
  0x1f   : > { %s230_s23 = sshll.u32 %s229_s17, 4  ;;  %s232_s27 = sshll.u32 %s224_s26, 4  ;;  %s231_s23 = int_to_ptr.hbm [resolvable:$true] %s230_s23  ;;  %s233_s27 = int_to_ptr.vmem [resolvable:$true] %s232_s27 }
  0x20   : > { %p1839_p9 = pnand %p1462_p5, %p39_p7  ;;  %s221_s6 = scalar_lea.sflag [#allocation3], %s220_s13 }
  0x21   : > { %s1599_s8 = sshra.s32 %s231_s23, 4  ;;  %s1606_s7 = scalar_lea.hbm %s2086_s0, 512  ;;  %s1600_s8 = int_to_ptr.hbm [resolvable:$true] %s1599_s8 }
  0x22   : > { %s1601_s11 = scalar_lea.hbm %s1600_s8, 256  ;;  %p1603_p10 = pneg %p1839_p9 }
  0x23   : > { %p1602_p2 = scmp.ne.s32.totalorder %s1600_s8, %s1601_s11  ;;  %p1607_p0 = scmp.lt.s32.totalorder %s1600_s8, %s2086_s0 }
  0x24   : > { %p1608_p5 = scmp.lt.s32.totalorder %s1606_s7, %s1601_s11 }
  0x25   : > { %p1604_p12 = pnand %p1603_p10, %p1602_p2 }
  0x26   : > { %p1609_p7 = por %p1608_p5, %p1607_p0 }
  0x27   : > { %p1605_p13 = pneg %p1604_p12 }
  0x29   : > { %p1610_p11 = pnand %p1609_p7, %p1605_p13 }
  0x2b   : > { %1613 = shalt.err (!%p1610_p11)
}
  0x2c   : > { %s2099_s13 = smov 128   ;;  %244 = sbr.rel (%p1787_p8) target bundleno = 618 (0x26a), region = 40 }
  0x2d   : > { %1454 = dma.hbm_to_vmem [thread:$0]  (!%p1839_p9), %s231_s23, 4096, %s233_s27, %s221_s6, %s2099_s13, %s2099_s13, %s1707_s12  }
  0x2e   : > { %s1859_s26 = sand.u32 (!%p1787_p8), 1, %s1695_s19  }
  0x2f   : > { %s1253_s11 = sshll.u32 (!%p1787_p8), %s1859_s26, 8  ;;  %s247_s8 = scalar_lea.sflag (!%p1787_p8), [#allocation3], %s1859_s26 }
  0x30   : > { %s1865_s14 = scalar_lea.vmem (!%p1787_p8), [#allocation2], %s1253_s11 }
  0x31   : > { %1674 = dma.done.wait (%p1774_p4), %s247_s8, 4096  }
  0x32   : > { %1676 = vsyncadd (%p1774_p4), %s247_s8, 4294963200 }
  0x33   : > { %1678 = dma.done.wait (%p44_p1), [#allocation6], 2080  }
  0x34   : > { %1680 = vsyncadd (%p44_p1), [#allocation6], 4294965216 }
  0x35   : > { %1682 = dma.done.wait (%p44_p1), [#allocation9], 2048  }
  0x36   : > { %1684 = vsyncadd (%p44_p1), [#allocation9], 4294965248  ;;  %v1316_v0 = vld [vmem:[#allocation5 + $0x70] sm:$0xf]  ;;  %v1407_v1 = vld [vmem:[#allocation5 + $0x74] sm:$0xf0] }
  0x37   : > { %v1406_v2 = vld [vmem:[#allocation5 + $0x74] sm:$0xf]  ;;  %v1317_v3 = vor.u32 %v1407_v1, %v1316_v0  ;;  %v1318_v4 = vld [vmem:[#allocation5 + $0x78] sm:$0xf0]  ;;  %v1308_v5 = vld [vmem:[#allocation5 + $0x60] sm:$0xf] }
  0x38   : > { %v1405_v6 = vld [vmem:[#allocation5 + $0x64] sm:$0xf0]  ;;  %v1321_v7 = vor.u32 %v1406_v2, %v1318_v4  ;;  %v1404_v8 = vld [vmem:[#allocation5 + $0x64] sm:$0xf]  ;;  %v1310_v9 = vld [vmem:[#allocation5 + $0x68] sm:$0xf0] }
  0x39   : > { %445 = vmatpush.bf16.msra.mxu0 %v1317_v3  ;;  %v1309_v10 = vor.u32 %v1405_v6, %v1308_v5  ;;  %v1313_v11 = vor.u32 %v1404_v8, %v1310_v9  ;;  %v1300_v12 = vld [vmem:[#allocation5 + $0x50] sm:$0xf]  ;;  %v1403_v13 = vld [vmem:[#allocation5 + $0x54] sm:$0xf0]  ;;  %v1402_v14 = vld [vmem:[#allocation5 + $0x54] sm:$0xf] }
  0x3a   : > { %534 = vmatpush.bf16.msra.mxu1 %v1321_v7  ;;  %v1302_v15 = vld [vmem:[#allocation5 + $0x58] sm:$0xf0]  ;;  %v1301_v16 = vor.u32 %v1403_v13, %v1300_v12  ;;  %v1292_v18 = vld [vmem:[#allocation5 + $0x40] sm:$0xf]  ;;  %v1401_v19 = vld [vmem:[#allocation5 + $0x44] sm:$0xf0] }
  0x3b   : > { %v1305_v17 = vor.u32 %v1402_v14, %v1302_v15  ;;  %v1400_v20 = vld [vmem:[#allocation5 + $0x44] sm:$0xf]  ;;  %v1294_v21 = vld [vmem:[#allocation5 + $0x48] sm:$0xf0]  ;;  %v1293_v22 = vor.u32 %v1401_v19, %v1292_v18  ;;  %v1284_v24 = vld [vmem:[#allocation5 + $0x30] sm:$0xf] }
  0x3c   : > { %v1297_v23 = vor.u32 %v1400_v20, %v1294_v21  ;;  %v1399_v25 = vld [vmem:[#allocation5 + $0x34] sm:$0xf0]  ;;  %v1398_v26 = vld [vmem:[#allocation5 + $0x34] sm:$0xf]  ;;  %v1286_v27 = vld [vmem:[#allocation5 + $0x38] sm:$0xf0] }
  0x3d   : > { %446 = vmatpush.bf16.msra.mxu0 %v1309_v10  ;;  %v1285_v28 = vor.u32 %v1399_v25, %v1284_v24  ;;  %v1289_v29 = vor.u32 %v1398_v26, %v1286_v27  ;;  %v1276_v30 = vld [vmem:[#allocation5 + $0x20] sm:$0xf]  ;;  %v1397_v31 = vld [vmem:[#allocation5 + $0x24] sm:$0xf0]  ;;  %v1396_v32 = vld [vmem:[#allocation5 + $0x24] sm:$0xf] }
  0x3e   : > { %535 = vmatpush.bf16.msra.mxu1 %v1313_v11  ;;  %v1278_v33 = vld [vmem:[#allocation5 + $0x28] sm:$0xf0]  ;;  %v1277_v34 = vor.u32 %v1397_v31, %v1276_v30  ;;  %v1268_v36 = vld [vmem:[#allocation5 + $0x10] sm:$0xf]  ;;  %v1395_v37 = vld [vmem:[#allocation5 + $0x14] sm:$0xf0] }
  0x3f   : > { %v1281_v35 = vor.u32 %v1396_v32, %v1278_v33  ;;  %v1394_v38 = vld [vmem:[#allocation5 + $0x14] sm:$0xf]  ;;  %v1270_v39 = vld [vmem:[#allocation5 + $0x18] sm:$0xf0]  ;;  %v1269_v40 = vor.u32 %v1395_v37, %v1268_v36  ;;  %v1260_v42 = vld [vmem:[#allocation5] sm:$0xf] }
  0x40   : > { %v1273_v41 = vor.u32 %v1394_v38, %v1270_v39  ;;  %v1393_v43 = vld [vmem:[#allocation5 + $0x4] sm:$0xf0]  ;;  %v1392_v44 = vld [vmem:[#allocation5 + $0x4] sm:$0xf]  ;;  %v1262_v45 = vld [vmem:[#allocation5 + $0x8] sm:$0xf0] }
  0x41   : > { %447 = vmatpush.bf16.msra.mxu0 %v1301_v16  ;;  %v1261_v46 = vor.u32 %v1393_v43, %v1260_v42  ;;  %v295_v47 = vld [vmem:[%s1865_s14] sm:$0xff]  ;;  %v296_v48 = vld [vmem:[%s1865_s14 + $0x8] sm:$0xff]  ;;  %v1265_v49 = vor.u32 %v1392_v44, %v1262_v45  ;;  %v297_v51 = vld [vmem:[%s1865_s14 + $0x10] sm:$0xff]  ;;  %s1961_s12 = scalar_lea.vmem [#allocation10], %s1253_s11  ;;  %s1424_s23 = sshll.u32 %s1765_s22, 8 }
  0x42   : > { %536 = vmatpush.bf16.msra.mxu1 %v1305_v17  ;;  %v327_v50 = vpack.c.bf16 %v296_v48, %v295_v47  ;;  %v298_v52 = vld [vmem:[%s1865_s14 + $0x18] sm:$0xff]  ;;  %v299_v54 = vld [vmem:[%s1865_s14 + $0x20] sm:$0xff]  ;;  %v300_v55 = vld [vmem:[%s1865_s14 + $0x28] sm:$0xff]  ;;  %s1137_s6 = scalar_lea.hbm %s2091_s5, %s1424_s23  ;;  %s1138_s15 = sshll.u32 %s1961_s12, 4  ;;  %s1139_s15 = int_to_ptr.vmem [resolvable:$true] %s1138_s15 }
  0x43   : > { %v328_v53 = vpack.c.bf16 %v298_v52, %v297_v51  ;;  %v329_v56 = vpack.c.bf16 %v300_v55, %v299_v54  ;;  %v301_v57 = vld [vmem:[%s1865_s14 + $0x30] sm:$0xff]  ;;  %v302_v58 = vld [vmem:[%s1865_s14 + $0x38] sm:$0xff]  ;;  %v303_v60 = vld [vmem:[%s1865_s14 + $0x40] sm:$0xff]  ;;  %s1140_s7 = sshll.u32 %s1137_s6, 4  ;;  %s1126_s16 = scalar_lea.sflag [#allocation4], %s1859_s26  ;;  %s1141_s7 = int_to_ptr.hbm [resolvable:$true] %s1140_s7 }
  0x44   : > { %v330_v59 = vpack.c.bf16 %v302_v58, %v301_v57  ;;  %v304_v61 = vld [vmem:[%s1865_s14 + $0x48] sm:$0xff]  ;;  %v1415_v63 = vld [vmem:[#allocation8 + $0x38] sm:$0xff]  ;;  %v305_v1 = vld [vmem:[%s1865_s14 + $0x50] sm:$0xff]  ;;  %s1643_s17 = sshra.s32 %s1141_s7, 4  ;;  %s1649_s8 = scalar_lea.hbm %s2091_s5, 512  ;;  %s1644_s17 = int_to_ptr.hbm [resolvable:$true] %s1643_s17 }
  0x45   : > { %448 = vmatpush.bf16.msra.mxu0 %v1293_v22  ;;  %v331_v62 = vpack.c.bf16 %v304_v61, %v303_v60  ;;  %v1423_v0 = vld [vmem:[#allocation8 + $0x78] sm:$0xff]  ;;  %915 = vmatpush.bf16.msra.mxu2 %v1415_v63  ;;  %v1414_v4 = vld [vmem:[#allocation8 + $0x30] sm:$0xff]  ;;  %v1413_v6 = vld [vmem:[#allocation8 + $0x28] sm:$0xff]  ;;  %s1645_s22 = scalar_lea.hbm %s1644_s17, 256  ;;  %p1650_p11 = scmp.lt.s32.totalorder %s1644_s17, %s2091_s5 }
  0x46   : > { %537 = vmatpush.bf16.msra.mxu1 %v1297_v23  ;;  %1004 = vmatpush.bf16.msra.mxu3 %v1423_v0  ;;  %v306_v2 = vld [vmem:[%s1865_s14 + $0x58] sm:$0xff]  ;;  %v1421_v7 = vld [vmem:[#allocation8 + $0x68] sm:$0xff]  ;;  %v1412_v8 = vld [vmem:[#allocation8 + $0x20] sm:$0xff]  ;;  %p1646_p1 = scmp.ne.s32.totalorder %s1644_s17, %s1645_s22  ;;  %p1651_p9 = scmp.lt.s32.totalorder %s1649_s8, %s1645_s22 }
  0x47   : > { %v332_v3 = vpack.c.bf16 %v306_v2, %v305_v1  ;;  %v1422_v5 = vld [vmem:[#allocation8 + $0x70] sm:$0xff]  ;;  %v1420_v9 = vld [vmem:[#allocation8 + $0x60] sm:$0xff]  ;;  %v1411_v13 = vld [vmem:[#allocation8 + $0x18] sm:$0xff] }
  0x48   : > { %v307_v10 = vld [vmem:[%s1865_s14 + $0x60] sm:$0xff]  ;;  %v308_v11 = vld [vmem:[%s1865_s14 + $0x68] sm:$0xff]  ;;  %v1410_v15 = vld [vmem:[#allocation8 + $0x10] sm:$0xff]  ;;  %p1647_p4 = pnand %p1646_p1, %p1829_p3  ;;  %p1652_p2 = por %p1651_p9, %p1650_p11 }
  0x49   : > { %449 = vmatpush.bf16.msra.mxu0 %v1285_v28  ;;  %916 = vmatpush.bf16.msra.mxu2 %v1414_v4  ;;  %v333_v12 = vpack.c.bf16 %v308_v11, %v307_v10  ;;  %v1419_v14 = vld [vmem:[#allocation8 + $0x58] sm:$0xff]  ;;  %v1418_v16 = vld [vmem:[#allocation8 + $0x50] sm:$0xff]  ;;  %v1409_v17 = vld [vmem:[#allocation8 + $0x8] sm:$0xff] }
  0x4a   : > { %538 = vmatpush.bf16.msra.mxu1 %v1289_v29  ;;  %1005 = vmatpush.bf16.msra.mxu3 %v1422_v5  ;;  %v1417_v18 = vld [vmem:[#allocation8 + $0x48] sm:$0xff]  ;;  %v310_v20 = vld [vmem:[%s1865_s14 + $0x78] sm:$0xff]  ;;  %v1408_v21 = vld [vmem:[#allocation8] sm:$0xff]  ;;  %p1648_p8 = pneg %p1647_p4 }
  0x4b   : > { %v309_v19 = vld [vmem:[%s1865_s14 + $0x70] sm:$0xff]  ;;  %v1416_v22 = vld [vmem:[#allocation8 + $0x40] sm:$0xff]  ;;  %v359_v26 = vld [vmem:[#allocation7] sm:$0x3] }
  0x4c   : > { %v334_v23 = vpack.c.bf16 %v310_v20, %v309_v19  ;;  %v311_v24 = vld [vmem:[%s1865_s14 + $0x80] sm:$0xff]  ;;  %v312_v25 = vld [vmem:[%s1865_s14 + $0x88] sm:$0xff]  ;;  %v1897_v29 = vperm.slane %v359_v26, 0  ;;  %v1899_v31 = vperm.slane %v359_v26, 1  ;;  %v313_v42 = vld [vmem:[%s1865_s14 + $0x90] sm:$0xff]  ;;  %p1653_p10 = pnand %p1652_p2, %p1648_p8 }
  0x4d   : > { %450 = vmatpush.bf16.msra.mxu0 %v1277_v34  ;;  %917 = vmatpush.bf16.msra.mxu2 %v1413_v6  ;;  %v335_v27 = vpack.c.bf16 %v312_v25, %v311_v24  ;;  %v314_v43 = vld [vmem:[%s1865_s14 + $0x98] sm:$0xff]  ;;  %v315_v63 = vld [vmem:[%s1865_s14 + $0xa0] sm:$0xff]  ;;  %v316_v0 = vld [vmem:[%s1865_s14 + $0xa8] sm:$0xff] }
  0x4e   : > { %539 = vmatpush.bf16.msra.mxu1 %v1281_v35  ;;  %1006 = vmatpush.bf16.msra.mxu3 %v1421_v7  ;;  %v337_v6 = vpack.c.bf16 %v316_v0, %v315_v63  ;;  %v317_v20 = vld [vmem:[%s1865_s14 + $0xb0] sm:$0xff] }
  0x4f   : > { %v321_v0 = vld [vmem:[%s1865_s14 + $0xd0] sm:$0xff] }
  0x51   : > { %451 = vmatpush.bf16.msra.mxu0 %v1269_v40  ;;  %918 = vmatpush.bf16.msra.mxu2 %v1412_v8 }
  0x52   : > { %540 = vmatpush.bf16.msra.mxu1 %v1273_v41  ;;  %1007 = vmatpush.bf16.msra.mxu3 %v1420_v9 }
  0x55   : > { %452 = vmatpush.bf16.msra.mxu0 %v1261_v46  ;;  %919 = vmatpush.bf16.msra.mxu2 %v1411_v13 }
  0x56   : > { %541 = vmatpush.bf16.msra.mxu1 %v1265_v49  ;;  %1008 = vmatpush.bf16.msra.mxu3 %v1419_v14  ;;  %v336_v49 = vpack.c.bf16 %v314_v43, %v313_v42  ;;  %v319_v43 = vld [vmem:[%s1865_s14 + $0xc0] sm:$0xff] }
  0x58   : > { %453 = vmatmul.bf16.vlgmr.msra.gmra.mxu0 %v327_v50 }
  0x59   : > { %542 = vmatmul.bf16.vlgmr.msra.gmra.mxu1 %v327_v50  ;;  %920 = vmatpush.bf16.msra.mxu2 %v1410_v15 }
  0x5a   : > { %1009 = vmatpush.bf16.msra.mxu3 %v1418_v16 }
  0x5d   : > { %921 = vmatpush.bf16.msra.mxu2 %v1409_v17 }
  0x5e   : > { %1010 = vmatpush.bf16.msra.mxu3 %v1417_v18 }
  0x61   : > { %922 = vmatpush.bf16.msra.mxu2 %v1408_v21  ;;  %v318_v21 = vld [vmem:[%s1865_s14 + $0xb8] sm:$0xff] }
  0x62   : > { %1011 = vmatpush.bf16.msra.mxu3 %v1416_v22 }
  0x68   : > { %458 = vmatmul.bf16.gmra.mxu0 %v328_v53 }
  0x69   : > { %547 = vmatmul.bf16.gmra.mxu1 %v328_v53 }
  0x78   : > { %463 = vmatmul.bf16.gmra.mxu0 %v329_v56 }
  0x79   : > { %552 = vmatmul.bf16.gmra.mxu1 %v329_v56 }
  0x88   : > { %468 = vmatmul.bf16.gmra.mxu0 %v330_v59 }
  0x89   : > { %557 = vmatmul.bf16.gmra.mxu1 %v330_v59 }
  0x98   : > { %473 = vmatmul.bf16.gmra.mxu0 %v331_v62 }
  0x99   : > { %562 = vmatmul.bf16.gmra.mxu1 %v331_v62 }
  0xa8   : > { %478 = vmatmul.bf16.gmra.mxu0 %v332_v3 }
  0xa9   : > { %567 = vmatmul.bf16.gmra.mxu1 %v332_v3 }
  0xb8   : > { %483 = vmatmul.bf16.gmra.mxu0 %v333_v12 }
  0xb9   : > { %572 = vmatmul.bf16.gmra.mxu1 %v333_v12 }
  0xc8   : > { %488 = vmatmul.bf16.gmra.mxu0 %v334_v23 }
  0xc9   : > { %577 = vmatmul.bf16.gmra.mxu1 %v334_v23 }
  0xd5   : > { %v454_v28 = vpop.f32.mrf.mxu0 }
  0xd6   : > { %v543_v30 = vpop.f32.mrf.mxu1  ;;  %v455_v32 = vadd.f32 %v454_v28, %v1897_v29 }
  0xd7   : > { %v544_v33 = vadd.f32 %v543_v30, %v1899_v31 }
  0xd8   : > { %493 = vmatmul.bf16.gmra.mxu0 %v335_v27  ;;  %v623_v35 = vmul.f32 0.2, %v455_v32 }
  0xd9   : > { %582 = vmatmul.bf16.gmra.mxu1 %v335_v27  ;;  %v624_v38 = vmul.f32 0.2, %v544_v33  ;;  %v338_v27 = vpack.c.bf16 %v318_v21, %v317_v20  ;;  %v323_v21 = vld [vmem:[%s1865_s14 + $0xe0] sm:$0xff] }
  0xda   : > { %v687_v44 = vmax.f32 %v455_v32, %v623_v35 }
  0xdb   : > { %v688_v46 = vmax.f32 %v544_v33, %v624_v38 }
  0xdd   : > { %v456_v34 = vpop.f32.mrf.mxu0 }
  0xde   : > { %v457_v36 = vadd.f32 %v456_v34, %v1897_v29  ;;  %v545_v37 = vpop.f32.mrf.mxu1 }
  0xdf   : > { %v546_v39 = vadd.f32 %v545_v37, %v1899_v31 }
  0xe0   : > { %v625_v40 = vmul.f32 0.2, %v457_v36 }
  0xe1   : > { %v626_v41 = vmul.f32 0.2, %v546_v39 }
  0xe2   : > { %v689_v45 = vmax.f32 %v457_v36, %v625_v40 }
  0xe3   : > { %v690_v47 = vmax.f32 %v546_v39, %v626_v41 }
  0xe4   : > { %v751_v48 = vpack.c.bf16 %v689_v45, %v687_v44  ;;  %v320_v44 = vld [vmem:[%s1865_s14 + $0xc8] sm:$0xff] }
  0xe5   : > { %v459_v50 = vpop.f32.mrf.mxu0  ;;  %v752_v51 = vpack.c.bf16 %v690_v47, %v688_v46 }
  0xe6   : > { %v548_v52 = vpop.f32.mrf.mxu1  ;;  %923 = vmatmul.bf16.vlgmr.msra.gmra.mxu2 %v751_v48  ;;  %v460_v53 = vadd.f32 %v459_v50, %v1897_v29  ;;  %v339_v50 = vpack.c.bf16 %v320_v44, %v319_v43  ;;  %v325_v44 = vld [vmem:[%s1865_s14 + $0xf0] sm:$0xff] }
  0xe7   : > { %1012 = vmatmul.bf16.vlgmr.msra.gmra.mxu3 %v752_v51  ;;  %v549_v54 = vadd.f32 %v548_v52, %v1899_v31 }
  0xe8   : > { %498 = vmatmul.bf16.gmra.mxu0 %v336_v49  ;;  %v627_v56 = vmul.f32 0.2, %v460_v53 }
  0xe9   : > { %587 = vmatmul.bf16.gmra.mxu1 %v336_v49  ;;  %v628_v59 = vmul.f32 0.2, %v549_v54 }
  0xea   : > { %v691_v1 = vmax.f32 %v460_v53, %v627_v56 }
  0xeb   : > { %v692_v3 = vmax.f32 %v549_v54, %v628_v59 }
  0xed   : > { %v461_v55 = vpop.f32.mrf.mxu0 }
  0xee   : > { %v462_v57 = vadd.f32 %v461_v55, %v1897_v29  ;;  %v550_v58 = vpop.f32.mrf.mxu1 }
  0xef   : > { %v551_v60 = vadd.f32 %v550_v58, %v1899_v31 }
  0xf0   : > { %v629_v61 = vmul.f32 0.2, %v462_v57 }
  0xf1   : > { %v630_v62 = vmul.f32 0.2, %v551_v60 }
  0xf2   : > { %v693_v2 = vmax.f32 %v462_v57, %v629_v61 }
  0xf3   : > { %v694_v4 = vmax.f32 %v551_v60, %v630_v62 }
  0xf4   : > { %v753_v5 = vpack.c.bf16 %v693_v2, %v691_v1  ;;  %v322_v1 = vld [vmem:[%s1865_s14 + $0xd8] sm:$0xff] }
  0xf5   : > { %v464_v7 = vpop.f32.mrf.mxu0  ;;  %v754_v8 = vpack.c.bf16 %v694_v4, %v692_v3 }
  0xf6   : > { %v553_v9 = vpop.f32.mrf.mxu1  ;;  %928 = vmatmul.bf16.gmra.mxu2 %v753_v5  ;;  %v465_v10 = vadd.f32 %v464_v7, %v1897_v29  ;;  %v340_v7 = vpack.c.bf16 %v322_v1, %v321_v0 }
  0xf7   : > { %1017 = vmatmul.bf16.gmra.mxu3 %v754_v8  ;;  %v554_v11 = vadd.f32 %v553_v9, %v1899_v31 }
  0xf8   : > { %503 = vmatmul.bf16.gmra.mxu0 %v337_v6  ;;  %v631_v13 = vmul.f32 0.2, %v465_v10 }
  0xf9   : > { %592 = vmatmul.bf16.gmra.mxu1 %v337_v6  ;;  %v632_v16 = vmul.f32 0.2, %v554_v11 }
  0xfa   : > { %v695_v22 = vmax.f32 %v465_v10, %v631_v13 }
  0xfb   : > { %v696_v24 = vmax.f32 %v554_v11, %v632_v16 }
  0xfd   : > { %v466_v12 = vpop.f32.mrf.mxu0 }
  0xfe   : > { %v467_v14 = vadd.f32 %v466_v12, %v1897_v29  ;;  %v555_v15 = vpop.f32.mrf.mxu1 }
  0xff   : > { %v556_v17 = vadd.f32 %v555_v15, %v1899_v31 }
 0x100   : > { %v633_v18 = vmul.f32 0.2, %v467_v14 }
 0x101   : > { %v634_v19 = vmul.f32 0.2, %v556_v17 }
 0x102   : > { %v697_v23 = vmax.f32 %v467_v14, %v633_v18 }
 0x103   : > { %v698_v25 = vmax.f32 %v556_v17, %v634_v19 }
 0x104   : > { %v755_v26 = vpack.c.bf16 %v697_v23, %v695_v22  ;;  %v324_v22 = vld [vmem:[%s1865_s14 + $0xe8] sm:$0xff] }
 0x105   : > { %v469_v28 = vpop.f32.mrf.mxu0  ;;  %v756_v30 = vpack.c.bf16 %v698_v25, %v696_v24 }
 0x106   : > { %v558_v32 = vpop.f32.mrf.mxu1  ;;  %933 = vmatmul.bf16.gmra.mxu2 %v755_v26  ;;  %v470_v33 = vadd.f32 %v469_v28, %v1897_v29  ;;  %v341_v28 = vpack.c.bf16 %v324_v22, %v323_v21 }
 0x107   : > { %1022 = vmatmul.bf16.gmra.mxu3 %v756_v30  ;;  %v559_v34 = vadd.f32 %v558_v32, %v1899_v31 }
 0x108   : > { %508 = vmatmul.bf16.gmra.mxu0 %v338_v27  ;;  %v635_v36 = vmul.f32 0.2, %v470_v33 }
 0x109   : > { %597 = vmatmul.bf16.gmra.mxu1 %v338_v27  ;;  %v636_v39 = vmul.f32 0.2, %v559_v34 }
 0x10a   : > { %v699_v45 = vmax.f32 %v470_v33, %v635_v36 }
 0x10b   : > { %v700_v47 = vmax.f32 %v559_v34, %v636_v39 }
 0x10d   : > { %v471_v35 = vpop.f32.mrf.mxu0 }
 0x10e   : > { %v472_v37 = vadd.f32 %v471_v35, %v1897_v29  ;;  %v560_v38 = vpop.f32.mrf.mxu1 }
 0x10f   : > { %v561_v40 = vadd.f32 %v560_v38, %v1899_v31 }
 0x110   : > { %v637_v41 = vmul.f32 0.2, %v472_v37 }
 0x111   : > { %v638_v42 = vmul.f32 0.2, %v561_v40 }
 0x112   : > { %v701_v46 = vmax.f32 %v472_v37, %v637_v41 }
 0x113   : > { %v702_v48 = vmax.f32 %v561_v40, %v638_v42 }
 0x114   : > { %v757_v49 = vpack.c.bf16 %v701_v46, %v699_v45  ;;  %v326_v45 = vld [vmem:[%s1865_s14 + $0xf8] sm:$0xff] }
 0x115   : > { %v474_v51 = vpop.f32.mrf.mxu0  ;;  %v758_v52 = vpack.c.bf16 %v702_v48, %v700_v47 }
 0x116   : > { %v563_v53 = vpop.f32.mrf.mxu1  ;;  %938 = vmatmul.bf16.gmra.mxu2 %v757_v49  ;;  %v475_v54 = vadd.f32 %v474_v51, %v1897_v29  ;;  %v342_v51 = vpack.c.bf16 %v326_v45, %v325_v44 }
 0x117   : > { %1027 = vmatmul.bf16.gmra.mxu3 %v758_v52  ;;  %v564_v55 = vadd.f32 %v563_v53, %v1899_v31 }
 0x118   : > { %513 = vmatmul.bf16.gmra.mxu0 %v339_v50  ;;  %v639_v57 = vmul.f32 0.2, %v475_v54 }
 0x119   : > { %602 = vmatmul.bf16.gmra.mxu1 %v339_v50  ;;  %v640_v60 = vmul.f32 0.2, %v564_v55 }
 0x11a   : > { %v703_v2 = vmax.f32 %v475_v54, %v639_v57 }
 0x11b   : > { %v704_v4 = vmax.f32 %v564_v55, %v640_v60 }
 0x11d   : > { %v476_v56 = vpop.f32.mrf.mxu0 }
 0x11e   : > { %v477_v58 = vadd.f32 %v476_v56, %v1897_v29  ;;  %v565_v59 = vpop.f32.mrf.mxu1 }
 0x11f   : > { %v566_v61 = vadd.f32 %v565_v59, %v1899_v31 }
 0x120   : > { %v641_v62 = vmul.f32 0.2, %v477_v58 }
 0x121   : > { %v642_v63 = vmul.f32 0.2, %v566_v61 }
 0x122   : > { %v705_v3 = vmax.f32 %v477_v58, %v641_v62 }
 0x123   : > { %v706_v5 = vmax.f32 %v566_v61, %v642_v63 }
 0x124   : > { %v759_v6 = vpack.c.bf16 %v705_v3, %v703_v2 }
 0x125   : > { %v479_v8 = vpop.f32.mrf.mxu0  ;;  %v760_v9 = vpack.c.bf16 %v706_v5, %v704_v4 }
 0x126   : > { %v568_v10 = vpop.f32.mrf.mxu1  ;;  %943 = vmatmul.bf16.gmra.mxu2 %v759_v6  ;;  %v480_v11 = vadd.f32 %v479_v8, %v1897_v29 }
 0x127   : > { %1032 = vmatmul.bf16.gmra.mxu3 %v760_v9  ;;  %v569_v12 = vadd.f32 %v568_v10, %v1899_v31 }
 0x128   : > { %518 = vmatmul.bf16.gmra.mxu0 %v340_v7  ;;  %v643_v14 = vmul.f32 0.2, %v480_v11 }
 0x129   : > { %607 = vmatmul.bf16.gmra.mxu1 %v340_v7  ;;  %v644_v17 = vmul.f32 0.2, %v569_v12 }
 0x12a   : > { %v707_v23 = vmax.f32 %v480_v11, %v643_v14 }
 0x12b   : > { %v708_v25 = vmax.f32 %v569_v12, %v644_v17 }
 0x12d   : > { %v481_v13 = vpop.f32.mrf.mxu0 }
 0x12e   : > { %v482_v15 = vadd.f32 %v481_v13, %v1897_v29  ;;  %v570_v16 = vpop.f32.mrf.mxu1 }
 0x12f   : > { %v571_v18 = vadd.f32 %v570_v16, %v1899_v31 }
 0x130   : > { %v645_v19 = vmul.f32 0.2, %v482_v15 }
 0x131   : > { %v646_v20 = vmul.f32 0.2, %v571_v18 }
 0x132   : > { %v709_v24 = vmax.f32 %v482_v15, %v645_v19 }
 0x133   : > { %v710_v26 = vmax.f32 %v571_v18, %v646_v20 }
 0x134   : > { %v761_v27 = vpack.c.bf16 %v709_v24, %v707_v23 }
 0x135   : > { %v484_v30 = vpop.f32.mrf.mxu0  ;;  %v762_v32 = vpack.c.bf16 %v710_v26, %v708_v25 }
 0x136   : > { %v573_v33 = vpop.f32.mrf.mxu1  ;;  %948 = vmatmul.bf16.gmra.mxu2 %v761_v27  ;;  %v485_v34 = vadd.f32 %v484_v30, %v1897_v29  ;;  %v1954_v27 = vld [vmem:[%s2090_s4] ss:$0 sm:$0xff] }
 0x137   : > { %1037 = vmatmul.bf16.gmra.mxu3 %v762_v32  ;;  %v574_v35 = vadd.f32 %v573_v33, %v1899_v31 }
 0x138   : > { %523 = vmatmul.bf16.gmra.mxu0 %v341_v28  ;;  %v647_v37 = vmul.f32 0.2, %v485_v34 }
 0x139   : > { %612 = vmatmul.bf16.gmra.mxu1 %v341_v28  ;;  %v648_v40 = vmul.f32 0.2, %v574_v35 }
 0x13a   : > { %v711_v46 = vmax.f32 %v485_v34, %v647_v37 }
 0x13b   : > { %v712_v48 = vmax.f32 %v574_v35, %v648_v40 }
 0x13d   : > { %v486_v36 = vpop.f32.mrf.mxu0 }
 0x13e   : > { %v487_v38 = vadd.f32 %v486_v36, %v1897_v29  ;;  %v575_v39 = vpop.f32.mrf.mxu1 }
 0x13f   : > { %v576_v41 = vadd.f32 %v575_v39, %v1899_v31 }
 0x140   : > { %v649_v42 = vmul.f32 0.2, %v487_v38 }
 0x141   : > { %v650_v43 = vmul.f32 0.2, %v576_v41 }
 0x142   : > { %v713_v47 = vmax.f32 %v487_v38, %v649_v42 }
 0x143   : > { %v714_v49 = vmax.f32 %v576_v41, %v650_v43 }
 0x144   : > { %v763_v50 = vpack.c.bf16 %v713_v47, %v711_v46 }
 0x145   : > { %v489_v52 = vpop.f32.mrf.mxu0  ;;  %v764_v53 = vpack.c.bf16 %v714_v49, %v712_v48 }
 0x146   : > { %v578_v54 = vpop.f32.mrf.mxu1  ;;  %953 = vmatmul.bf16.gmra.mxu2 %v763_v50  ;;  %v490_v55 = vadd.f32 %v489_v52, %v1897_v29 }
 0x147   : > { %1042 = vmatmul.bf16.gmra.mxu3 %v764_v53  ;;  %v579_v56 = vadd.f32 %v578_v54, %v1899_v31 }
 0x148   : > { %528 = vmatmul.bf16.gmra.mxu0 %v342_v51  ;;  %v651_v58 = vmul.f32 0.2, %v490_v55 }
 0x149   : > { %617 = vmatmul.bf16.gmra.mxu1 %v342_v51  ;;  %v652_v61 = vmul.f32 0.2, %v579_v56 }
 0x14a   : > { %v715_v1 = vmax.f32 %v490_v55, %v651_v58 }
 0x14b   : > { %v716_v3 = vmax.f32 %v579_v56, %v652_v61 }
 0x14d   : > { %v491_v57 = vpop.f32.mrf.mxu0 }
 0x14e   : > { %v492_v59 = vadd.f32 %v491_v57, %v1897_v29  ;;  %v580_v60 = vpop.f32.mrf.mxu1 }
 0x14f   : > { %v581_v62 = vadd.f32 %v580_v60, %v1899_v31 }
 0x150   : > { %v653_v63 = vmul.f32 0.2, %v492_v59 }
 0x151   : > { %v654_v0 = vmul.f32 0.2, %v581_v62 }
 0x152   : > { %v717_v2 = vmax.f32 %v492_v59, %v653_v63 }
 0x153   : > { %v718_v4 = vmax.f32 %v581_v62, %v654_v0 }
 0x154   : > { %v765_v5 = vpack.c.bf16 %v717_v2, %v715_v1 }
 0x155   : > { %v494_v6 = vpop.f32.mrf.mxu0  ;;  %v766_v7 = vpack.c.bf16 %v718_v4, %v716_v3 }
 0x156   : > { %v583_v8 = vpop.f32.mrf.mxu1  ;;  %958 = vmatmul.bf16.gmra.mxu2 %v765_v5  ;;  %v495_v9 = vadd.f32 %v494_v6, %v1897_v29 }
 0x157   : > { %1047 = vmatmul.bf16.gmra.mxu3 %v766_v7  ;;  %v584_v10 = vadd.f32 %v583_v8, %v1899_v31 }
 0x158   : > { %v655_v12 = vmul.f32 0.2, %v495_v9 }
 0x159   : > { %v656_v15 = vmul.f32 0.2, %v584_v10 }
 0x15a   : > { %v719_v19 = vmax.f32 %v495_v9, %v655_v12 }
 0x15b   : > { %v720_v21 = vmax.f32 %v584_v10, %v656_v15 }
 0x15d   : > { %v496_v11 = vpop.f32.mrf.mxu0 }
 0x15e   : > { %v497_v13 = vadd.f32 %v496_v11, %v1897_v29  ;;  %v585_v14 = vpop.f32.mrf.mxu1 }
 0x15f   : > { %v586_v16 = vadd.f32 %v585_v14, %v1899_v31 }
 0x160   : > { %v657_v17 = vmul.f32 0.2, %v497_v13 }
 0x161   : > { %v658_v18 = vmul.f32 0.2, %v586_v16 }
 0x162   : > { %v721_v20 = vmax.f32 %v497_v13, %v657_v17 }
 0x163   : > { %v722_v22 = vmax.f32 %v586_v16, %v658_v18 }
 0x164   : > { %v767_v23 = vpack.c.bf16 %v721_v20, %v719_v19 }
 0x165   : > { %v499_v24 = vpop.f32.mrf.mxu0  ;;  %v768_v25 = vpack.c.bf16 %v722_v22, %v720_v21 }
 0x166   : > { %v588_v26 = vpop.f32.mrf.mxu1  ;;  %963 = vmatmul.bf16.gmra.mxu2 %v767_v23  ;;  %v500_v30 = vadd.f32 %v499_v24, %v1897_v29 }
 0x167   : > { %1052 = vmatmul.bf16.gmra.mxu3 %v768_v25  ;;  %v589_v34 = vadd.f32 %v588_v26, %v1899_v31 }
 0x168   : > { %v659_v37 = vmul.f32 0.2, %v500_v30 }
 0x169   : > { %v924_v28 = vpop.f32.mrf.mxu2  ;;  %v660_v40 = vmul.f32 0.2, %v589_v34 }
 0x16a   : > { %v925_v32 = vadd.f32 %v1954_v27, %v924_v28  ;;  %v1013_v33 = vpop.f32.mrf.mxu3  ;;  %v723_v45 = vmax.f32 %v500_v30, %v659_v37 }
 0x16b   : > { %v724_v49 = vmax.f32 %v589_v34, %v660_v40 }
 0x16c   : > { %v1014_v35 = vadd.f32 %v1013_v33, %v925_v32 }
 0x16d   : > { %v501_v36 = vpop.f32.mrf.mxu0 }
 0x16e   : > { %1093 = vst [vmem:[%s1961_s12] sm:$0xff] %v1014_v35  ;;  %v502_v38 = vadd.f32 %v501_v36, %v1897_v29  ;;  %v590_v39 = vpop.f32.mrf.mxu1 }
 0x16f   : > { %v591_v41 = vadd.f32 %v590_v39, %v1899_v31 }
 0x170   : > { %v661_v42 = vmul.f32 0.2, %v502_v38 }
 0x171   : > { %v662_v43 = vmul.f32 0.2, %v591_v41  ;;  %v926_v44 = vpop.f32.mrf.mxu2 }
 0x172   : > { %v725_v46 = vmax.f32 %v502_v38, %v661_v42  ;;  %v927_v47 = vadd.f32 %v1954_v27, %v926_v44  ;;  %v1015_v48 = vpop.f32.mrf.mxu3 }
 0x173   : > { %v726_v50 = vmax.f32 %v591_v41, %v662_v43 }
 0x174   : > { %v1016_v51 = vadd.f32 %v1015_v48, %v927_v47  ;;  %v769_v52 = vpack.c.bf16 %v725_v46, %v723_v45 }
 0x175   : > { %v504_v53 = vpop.f32.mrf.mxu0  ;;  %v770_v54 = vpack.c.bf16 %v726_v50, %v724_v49 }
 0x176   : > { %1094 = vst [vmem:[%s1961_s12 + $0x8] sm:$0xff] %v1016_v51  ;;  %v593_v55 = vpop.f32.mrf.mxu1  ;;  %968 = vmatmul.bf16.gmra.mxu2 %v769_v52  ;;  %v505_v57 = vadd.f32 %v504_v53, %v1897_v29 }
 0x177   : > { %1057 = vmatmul.bf16.gmra.mxu3 %v770_v54  ;;  %v594_v60 = vadd.f32 %v593_v55, %v1899_v31 }
 0x178   : > { %v663_v63 = vmul.f32 0.2, %v505_v57 }
 0x179   : > { %v929_v56 = vpop.f32.mrf.mxu2  ;;  %v664_v2 = vmul.f32 0.2, %v594_v60 }
 0x17a   : > { %v930_v58 = vadd.f32 %v1954_v27, %v929_v56  ;;  %v1018_v59 = vpop.f32.mrf.mxu3  ;;  %v727_v7 = vmax.f32 %v505_v57, %v663_v63 }
 0x17b   : > { %v728_v11 = vmax.f32 %v594_v60, %v664_v2 }
 0x17c   : > { %v1019_v61 = vadd.f32 %v1018_v59, %v930_v58 }
 0x17d   : > { %v506_v62 = vpop.f32.mrf.mxu0 }
 0x17e   : > { %1095 = vst [vmem:[%s1961_s12 + $0x10] sm:$0xff] %v1019_v61  ;;  %v507_v0 = vadd.f32 %v506_v62, %v1897_v29  ;;  %v595_v1 = vpop.f32.mrf.mxu1 }
 0x17f   : > { %v596_v3 = vadd.f32 %v595_v1, %v1899_v31 }
 0x180   : > { %v665_v4 = vmul.f32 0.2, %v507_v0 }
 0x181   : > { %v666_v5 = vmul.f32 0.2, %v596_v3  ;;  %v931_v6 = vpop.f32.mrf.mxu2 }
 0x182   : > { %v729_v8 = vmax.f32 %v507_v0, %v665_v4  ;;  %v932_v9 = vadd.f32 %v1954_v27, %v931_v6  ;;  %v1020_v10 = vpop.f32.mrf.mxu3 }
 0x183   : > { %v730_v12 = vmax.f32 %v596_v3, %v666_v5 }
 0x184   : > { %v1021_v13 = vadd.f32 %v1020_v10, %v932_v9  ;;  %v771_v14 = vpack.c.bf16 %v729_v8, %v727_v7 }
 0x185   : > { %v509_v15 = vpop.f32.mrf.mxu0  ;;  %v772_v16 = vpack.c.bf16 %v730_v12, %v728_v11 }
 0x186   : > { %1096 = vst [vmem:[%s1961_s12 + $0x18] sm:$0xff] %v1021_v13  ;;  %v598_v17 = vpop.f32.mrf.mxu1  ;;  %973 = vmatmul.bf16.gmra.mxu2 %v771_v14  ;;  %v510_v19 = vadd.f32 %v509_v15, %v1897_v29 }
 0x187   : > { %1062 = vmatmul.bf16.gmra.mxu3 %v772_v16  ;;  %v599_v22 = vadd.f32 %v598_v17, %v1899_v31 }
 0x188   : > { %v667_v25 = vmul.f32 0.2, %v510_v19 }
 0x189   : > { %v934_v18 = vpop.f32.mrf.mxu2  ;;  %v668_v30 = vmul.f32 0.2, %v599_v22 }
 0x18a   : > { %v935_v20 = vadd.f32 %v1954_v27, %v934_v18  ;;  %v1023_v21 = vpop.f32.mrf.mxu3  ;;  %v731_v36 = vmax.f32 %v510_v19, %v667_v25 }
 0x18b   : > { %v732_v40 = vmax.f32 %v599_v22, %v668_v30 }
 0x18c   : > { %v1024_v23 = vadd.f32 %v1023_v21, %v935_v20 }
 0x18d   : > { %v511_v24 = vpop.f32.mrf.mxu0 }
 0x18e   : > { %1097 = vst [vmem:[%s1961_s12 + $0x20] sm:$0xff] %v1024_v23  ;;  %v512_v26 = vadd.f32 %v511_v24, %v1897_v29  ;;  %v600_v28 = vpop.f32.mrf.mxu1 }
 0x18f   : > { %v601_v32 = vadd.f32 %v600_v28, %v1899_v31 }
 0x190   : > { %v669_v33 = vmul.f32 0.2, %v512_v26 }
 0x191   : > { %v670_v34 = vmul.f32 0.2, %v601_v32  ;;  %v936_v35 = vpop.f32.mrf.mxu2 }
 0x192   : > { %v733_v37 = vmax.f32 %v512_v26, %v669_v33  ;;  %v937_v38 = vadd.f32 %v1954_v27, %v936_v35  ;;  %v1025_v39 = vpop.f32.mrf.mxu3 }
 0x193   : > { %v734_v41 = vmax.f32 %v601_v32, %v670_v34 }
 0x194   : > { %v1026_v42 = vadd.f32 %v1025_v39, %v937_v38  ;;  %v773_v43 = vpack.c.bf16 %v733_v37, %v731_v36 }
 0x195   : > { %v514_v44 = vpop.f32.mrf.mxu0  ;;  %v774_v45 = vpack.c.bf16 %v734_v41, %v732_v40 }
 0x196   : > { %1098 = vst [vmem:[%s1961_s12 + $0x28] sm:$0xff] %v1026_v42  ;;  %v603_v46 = vpop.f32.mrf.mxu1  ;;  %978 = vmatmul.bf16.gmra.mxu2 %v773_v43  ;;  %v515_v48 = vadd.f32 %v514_v44, %v1897_v29 }
 0x197   : > { %1067 = vmatmul.bf16.gmra.mxu3 %v774_v45  ;;  %v604_v51 = vadd.f32 %v603_v46, %v1899_v31 }
 0x198   : > { %v671_v54 = vmul.f32 0.2, %v515_v48 }
 0x199   : > { %v939_v47 = vpop.f32.mrf.mxu2  ;;  %v672_v57 = vmul.f32 0.2, %v604_v51 }
 0x19a   : > { %v940_v49 = vadd.f32 %v1954_v27, %v939_v47  ;;  %v1028_v50 = vpop.f32.mrf.mxu3  ;;  %v735_v62 = vmax.f32 %v515_v48, %v671_v54 }
 0x19b   : > { %v736_v2 = vmax.f32 %v604_v51, %v672_v57 }
 0x19c   : > { %v1029_v52 = vadd.f32 %v1028_v50, %v940_v49 }
 0x19d   : > { %v516_v53 = vpop.f32.mrf.mxu0 }
 0x19e   : > { %1099 = vst [vmem:[%s1961_s12 + $0x30] sm:$0xff] %v1029_v52  ;;  %v517_v55 = vadd.f32 %v516_v53, %v1897_v29  ;;  %v605_v56 = vpop.f32.mrf.mxu1 }
 0x19f   : > { %v606_v58 = vadd.f32 %v605_v56, %v1899_v31 }
 0x1a0   : > { %v673_v59 = vmul.f32 0.2, %v517_v55 }
 0x1a1   : > { %v674_v60 = vmul.f32 0.2, %v606_v58  ;;  %v941_v61 = vpop.f32.mrf.mxu2 }
 0x1a2   : > { %v737_v63 = vmax.f32 %v517_v55, %v673_v59  ;;  %v942_v0 = vadd.f32 %v1954_v27, %v941_v61  ;;  %v1030_v1 = vpop.f32.mrf.mxu3 }
 0x1a3   : > { %v738_v3 = vmax.f32 %v606_v58, %v674_v60 }
 0x1a4   : > { %v1031_v4 = vadd.f32 %v1030_v1, %v942_v0  ;;  %v775_v5 = vpack.c.bf16 %v737_v63, %v735_v62 }
 0x1a5   : > { %v519_v6 = vpop.f32.mrf.mxu0  ;;  %v776_v7 = vpack.c.bf16 %v738_v3, %v736_v2 }
 0x1a6   : > { %1100 = vst [vmem:[%s1961_s12 + $0x38] sm:$0xff] %v1031_v4  ;;  %v608_v8 = vpop.f32.mrf.mxu1  ;;  %983 = vmatmul.bf16.gmra.mxu2 %v775_v5  ;;  %v520_v10 = vadd.f32 %v519_v6, %v1897_v29 }
 0x1a7   : > { %1072 = vmatmul.bf16.gmra.mxu3 %v776_v7  ;;  %v609_v13 = vadd.f32 %v608_v8, %v1899_v31 }
 0x1a8   : > { %v675_v16 = vmul.f32 0.2, %v520_v10 }
 0x1a9   : > { %v944_v9 = vpop.f32.mrf.mxu2  ;;  %v676_v19 = vmul.f32 0.2, %v609_v13 }
 0x1aa   : > { %v945_v11 = vadd.f32 %v1954_v27, %v944_v9  ;;  %v1033_v12 = vpop.f32.mrf.mxu3  ;;  %v739_v24 = vmax.f32 %v520_v10, %v675_v16 }
 0x1ab   : > { %v740_v30 = vmax.f32 %v609_v13, %v676_v19 }
 0x1ac   : > { %v1034_v14 = vadd.f32 %v1033_v12, %v945_v11 }
 0x1ad   : > { %v521_v15 = vpop.f32.mrf.mxu0 }
 0x1ae   : > { %1101 = vst [vmem:[%s1961_s12 + $0x40] sm:$0xff] %v1034_v14  ;;  %v522_v17 = vadd.f32 %v521_v15, %v1897_v29  ;;  %v610_v18 = vpop.f32.mrf.mxu1 }
 0x1af   : > { %v611_v20 = vadd.f32 %v610_v18, %v1899_v31 }
 0x1b0   : > { %v677_v21 = vmul.f32 0.2, %v522_v17 }
 0x1b1   : > { %v678_v22 = vmul.f32 0.2, %v611_v20  ;;  %v946_v23 = vpop.f32.mrf.mxu2 }
 0x1b2   : > { %v741_v25 = vmax.f32 %v522_v17, %v677_v21  ;;  %v947_v26 = vadd.f32 %v1954_v27, %v946_v23  ;;  %v1035_v28 = vpop.f32.mrf.mxu3 }
 0x1b3   : > { %v742_v32 = vmax.f32 %v611_v20, %v678_v22 }
 0x1b4   : > { %v1036_v33 = vadd.f32 %v1035_v28, %v947_v26  ;;  %v777_v34 = vpack.c.bf16 %v741_v25, %v739_v24 }
 0x1b5   : > { %v524_v35 = vpop.f32.mrf.mxu0  ;;  %v778_v36 = vpack.c.bf16 %v742_v32, %v740_v30 }
 0x1b6   : > { %1102 = vst [vmem:[%s1961_s12 + $0x48] sm:$0xff] %v1036_v33  ;;  %v613_v37 = vpop.f32.mrf.mxu1  ;;  %988 = vmatmul.bf16.gmra.mxu2 %v777_v34  ;;  %v525_v39 = vadd.f32 %v524_v35, %v1897_v29 }
 0x1b7   : > { %1077 = vmatmul.bf16.gmra.mxu3 %v778_v36  ;;  %v614_v42 = vadd.f32 %v613_v37, %v1899_v31 }
 0x1b8   : > { %v679_v45 = vmul.f32 0.2, %v525_v39 }
 0x1b9   : > { %v949_v38 = vpop.f32.mrf.mxu2  ;;  %v680_v48 = vmul.f32 0.2, %v614_v42 }
 0x1ba   : > { %v950_v40 = vadd.f32 %v1954_v27, %v949_v38  ;;  %v1038_v41 = vpop.f32.mrf.mxu3  ;;  %v743_v53 = vmax.f32 %v525_v39, %v679_v45 }
 0x1bb   : > { %v744_v57 = vmax.f32 %v614_v42, %v680_v48 }
 0x1bc   : > { %v1039_v43 = vadd.f32 %v1038_v41, %v950_v40 }
 0x1bd   : > { %v526_v44 = vpop.f32.mrf.mxu0 }
 0x1be   : > { %1103 = vst [vmem:[%s1961_s12 + $0x50] sm:$0xff] %v1039_v43  ;;  %v527_v46 = vadd.f32 %v526_v44, %v1897_v29  ;;  %v615_v47 = vpop.f32.mrf.mxu1 }
 0x1bf   : > { %v616_v49 = vadd.f32 %v615_v47, %v1899_v31 }
 0x1c0   : > { %v681_v50 = vmul.f32 0.2, %v527_v46 }
 0x1c1   : > { %v682_v51 = vmul.f32 0.2, %v616_v49  ;;  %v951_v52 = vpop.f32.mrf.mxu2 }
 0x1c2   : > { %v745_v54 = vmax.f32 %v527_v46, %v681_v50  ;;  %v952_v55 = vadd.f32 %v1954_v27, %v951_v52  ;;  %v1040_v56 = vpop.f32.mrf.mxu3 }
 0x1c3   : > { %v746_v58 = vmax.f32 %v616_v49, %v682_v51 }
 0x1c4   : > { %v1041_v59 = vadd.f32 %v1040_v56, %v952_v55  ;;  %v779_v60 = vpack.c.bf16 %v745_v54, %v743_v53 }
 0x1c5   : > { %v529_v61 = vpop.f32.mrf.mxu0  ;;  %v780_v62 = vpack.c.bf16 %v746_v58, %v744_v57 }
 0x1c6   : > { %1104 = vst [vmem:[%s1961_s12 + $0x58] sm:$0xff] %v1041_v59  ;;  %v618_v63 = vpop.f32.mrf.mxu1  ;;  %993 = vmatmul.bf16.gmra.mxu2 %v779_v60  ;;  %v530_v1 = vadd.f32 %v529_v61, %v1897_v29 }
 0x1c7   : > { %1082 = vmatmul.bf16.gmra.mxu3 %v780_v62  ;;  %v619_v4 = vadd.f32 %v618_v63, %v1899_v31 }
 0x1c8   : > { %v683_v7 = vmul.f32 0.2, %v530_v1 }
 0x1c9   : > { %v954_v0 = vpop.f32.mrf.mxu2  ;;  %v684_v10 = vmul.f32 0.2, %v619_v4 }
 0x1ca   : > { %v955_v2 = vadd.f32 %v1954_v27, %v954_v0  ;;  %v1043_v3 = vpop.f32.mrf.mxu3  ;;  %v747_v15 = vmax.f32 %v530_v1, %v683_v7 }
 0x1cb   : > { %v748_v19 = vmax.f32 %v619_v4, %v684_v10 }
 0x1cc   : > { %v1044_v5 = vadd.f32 %v1043_v3, %v955_v2 }
 0x1cd   : > { %v531_v6 = vpop.f32.mrf.mxu0 }
 0x1ce   : > { %1105 = vst [vmem:[%s1961_s12 + $0x60] sm:$0xff] %v1044_v5  ;;  %v532_v8 = vadd.f32 %v531_v6, %v1897_v29  ;;  %v620_v9 = vpop.f32.mrf.mxu1 }
 0x1cf   : > { %v621_v11 = vadd.f32 %v620_v9, %v1899_v31 }
 0x1d0   : > { %v685_v12 = vmul.f32 0.2, %v532_v8 }
 0x1d1   : > { %v686_v13 = vmul.f32 0.2, %v621_v11  ;;  %v956_v14 = vpop.f32.mrf.mxu2 }
 0x1d2   : > { %v749_v16 = vmax.f32 %v532_v8, %v685_v12  ;;  %v957_v17 = vadd.f32 %v1954_v27, %v956_v14  ;;  %v1045_v18 = vpop.f32.mrf.mxu3 }
 0x1d3   : > { %v750_v20 = vmax.f32 %v621_v11, %v686_v13 }
 0x1d4   : > { %v1046_v21 = vadd.f32 %v1045_v18, %v957_v17  ;;  %v781_v22 = vpack.c.bf16 %v749_v16, %v747_v15 }
 0x1d5   : > { %v782_v29 = vpack.c.bf16 %v750_v20, %v748_v19 }
 0x1d6   : > { %1106 = vst [vmem:[%s1961_s12 + $0x68] sm:$0xff] %v1046_v21  ;;  %998 = vmatmul.bf16.gmra.mxu2 %v781_v22 }
 0x1d7   : > { %1087 = vmatmul.bf16.gmra.mxu3 %v782_v29 }
 0x1d9   : > { %v959_v31 = vpop.f32.mrf.mxu2 }
 0x1da   : > { %v960_v23 = vadd.f32 %v1954_v27, %v959_v31  ;;  %v1048_v24 = vpop.f32.mrf.mxu3 }
 0x1dc   : > { %v1049_v25 = vadd.f32 %v1048_v24, %v960_v23 }
 0x1de   : > { %1107 = vst [vmem:[%s1961_s12 + $0x70] sm:$0xff] %v1049_v25 }
 0x1e1   : > { %v961_v26 = vpop.f32.mrf.mxu2 }
 0x1e2   : > { %v962_v28 = vadd.f32 %v1954_v27, %v961_v26  ;;  %v1050_v30 = vpop.f32.mrf.mxu3 }
 0x1e4   : > { %v1051_v32 = vadd.f32 %v1050_v30, %v962_v28 }
 0x1e6   : > { %1108 = vst [vmem:[%s1961_s12 + $0x78] sm:$0xff] %v1051_v32 }
 0x1e9   : > { %v964_v33 = vpop.f32.mrf.mxu2 }
 0x1ea   : > { %v965_v34 = vadd.f32 %v1954_v27, %v964_v33  ;;  %v1053_v35 = vpop.f32.mrf.mxu3 }
 0x1ec   : > { %v1054_v36 = vadd.f32 %v1053_v35, %v965_v34 }
 0x1ee   : > { %1109 = vst [vmem:[%s1961_s12 + $0x80] sm:$0xff] %v1054_v36 }
 0x1f1   : > { %v966_v37 = vpop.f32.mrf.mxu2 }
 0x1f2   : > { %v967_v38 = vadd.f32 %v1954_v27, %v966_v37  ;;  %v1055_v39 = vpop.f32.mrf.mxu3 }
 0x1f4   : > { %v1056_v40 = vadd.f32 %v1055_v39, %v967_v38 }
 0x1f6   : > { %1110 = vst [vmem:[%s1961_s12 + $0x88] sm:$0xff] %v1056_v40 }
 0x1f9   : > { %v969_v41 = vpop.f32.mrf.mxu2 }
 0x1fa   : > { %v970_v42 = vadd.f32 %v1954_v27, %v969_v41  ;;  %v1058_v43 = vpop.f32.mrf.mxu3 }
 0x1fc   : > { %v1059_v44 = vadd.f32 %v1058_v43, %v970_v42 }
 0x1fe   : > { %1111 = vst [vmem:[%s1961_s12 + $0x90] sm:$0xff] %v1059_v44 }
 0x201   : > { %v971_v45 = vpop.f32.mrf.mxu2 }
 0x202   : > { %v972_v46 = vadd.f32 %v1954_v27, %v971_v45  ;;  %v1060_v47 = vpop.f32.mrf.mxu3 }
 0x204   : > { %v1061_v48 = vadd.f32 %v1060_v47, %v972_v46 }
 0x206   : > { %1112 = vst [vmem:[%s1961_s12 + $0x98] sm:$0xff] %v1061_v48 }
 0x209   : > { %v974_v49 = vpop.f32.mrf.mxu2 }
 0x20a   : > { %v975_v50 = vadd.f32 %v1954_v27, %v974_v49  ;;  %v1063_v51 = vpop.f32.mrf.mxu3 }
 0x20c   : > { %v1064_v52 = vadd.f32 %v1063_v51, %v975_v50 }
 0x20e   : > { %1113 = vst [vmem:[%s1961_s12 + $0xa0] sm:$0xff] %v1064_v52 }
 0x211   : > { %v976_v53 = vpop.f32.mrf.mxu2 }
 0x212   : > { %v977_v54 = vadd.f32 %v1954_v27, %v976_v53  ;;  %v1065_v55 = vpop.f32.mrf.mxu3 }
 0x214   : > { %v1066_v56 = vadd.f32 %v1065_v55, %v977_v54 }
 0x216   : > { %1114 = vst [vmem:[%s1961_s12 + $0xa8] sm:$0xff] %v1066_v56 }
 0x219   : > { %v979_v57 = vpop.f32.mrf.mxu2 }
 0x21a   : > { %v980_v58 = vadd.f32 %v1954_v27, %v979_v57  ;;  %v1068_v59 = vpop.f32.mrf.mxu3 }
 0x21c   : > { %v1069_v60 = vadd.f32 %v1068_v59, %v980_v58 }
 0x21e   : > { %1115 = vst [vmem:[%s1961_s12 + $0xb0] sm:$0xff] %v1069_v60 }
 0x221   : > { %v981_v61 = vpop.f32.mrf.mxu2 }
 0x222   : > { %v982_v62 = vadd.f32 %v1954_v27, %v981_v61  ;;  %v1070_v63 = vpop.f32.mrf.mxu3 }
 0x224   : > { %v1071_v0 = vadd.f32 %v1070_v63, %v982_v62 }
 0x226   : > { %1116 = vst [vmem:[%s1961_s12 + $0xb8] sm:$0xff] %v1071_v0 }
 0x229   : > { %v984_v1 = vpop.f32.mrf.mxu2 }
 0x22a   : > { %v985_v2 = vadd.f32 %v1954_v27, %v984_v1  ;;  %v1073_v3 = vpop.f32.mrf.mxu3 }
 0x22c   : > { %v1074_v4 = vadd.f32 %v1073_v3, %v985_v2 }
 0x22e   : > { %1117 = vst [vmem:[%s1961_s12 + $0xc0] sm:$0xff] %v1074_v4 }
 0x231   : > { %v986_v5 = vpop.f32.mrf.mxu2 }
 0x232   : > { %v987_v6 = vadd.f32 %v1954_v27, %v986_v5  ;;  %v1075_v7 = vpop.f32.mrf.mxu3 }
 0x234   : > { %v1076_v8 = vadd.f32 %v1075_v7, %v987_v6 }
 0x236   : > { %1118 = vst [vmem:[%s1961_s12 + $0xc8] sm:$0xff] %v1076_v8 }
 0x239   : > { %v989_v9 = vpop.f32.mrf.mxu2 }
 0x23a   : > { %v990_v10 = vadd.f32 %v1954_v27, %v989_v9  ;;  %v1078_v11 = vpop.f32.mrf.mxu3 }
 0x23c   : > { %v1079_v12 = vadd.f32 %v1078_v11, %v990_v10 }
 0x23e   : > { %1119 = vst [vmem:[%s1961_s12 + $0xd0] sm:$0xff] %v1079_v12 }
 0x241   : > { %v991_v13 = vpop.f32.mrf.mxu2 }
 0x242   : > { %v992_v14 = vadd.f32 %v1954_v27, %v991_v13  ;;  %v1080_v15 = vpop.f32.mrf.mxu3 }
 0x244   : > { %v1081_v16 = vadd.f32 %v1080_v15, %v992_v14 }
 0x246   : > { %1120 = vst [vmem:[%s1961_s12 + $0xd8] sm:$0xff] %v1081_v16 }
 0x249   : > { %v994_v17 = vpop.f32.mrf.mxu2 }
 0x24a   : > { %v995_v18 = vadd.f32 %v1954_v27, %v994_v17  ;;  %v1083_v19 = vpop.f32.mrf.mxu3 }
 0x24c   : > { %v1084_v20 = vadd.f32 %v1083_v19, %v995_v18 }
 0x24e   : > { %1121 = vst [vmem:[%s1961_s12 + $0xe0] sm:$0xff] %v1084_v20 }
 0x251   : > { %v996_v21 = vpop.f32.mrf.mxu2 }
 0x252   : > { %v997_v22 = vadd.f32 %v1954_v27, %v996_v21  ;;  %v1085_v29 = vpop.f32.mrf.mxu3 }
 0x254   : > { %v1086_v31 = vadd.f32 %v1085_v29, %v997_v22 }
 0x256   : > { %1122 = vst [vmem:[%s1961_s12 + $0xe8] sm:$0xff] %v1086_v31 }
 0x259   : > { %v999_v23 = vpop.f32.mrf.mxu2 }
 0x25a   : > { %v1000_v24 = vadd.f32 %v1954_v27, %v999_v23  ;;  %v1088_v25 = vpop.f32.mrf.mxu3 }
 0x25c   : > { %v1089_v26 = vadd.f32 %v1088_v25, %v1000_v24 }
 0x25e   : > { %1123 = vst [vmem:[%s1961_s12 + $0xf0] sm:$0xff] %v1089_v26 }
 0x261   : > { %v1001_v28 = vpop.f32.mrf.mxu2 }
 0x262   : > { %v1002_v30 = vadd.f32 %v1954_v27, %v1001_v28  ;;  %v1090_v32 = vpop.f32.mrf.mxu3 }
 0x264   : > { %v1091_v33 = vadd.f32 %v1090_v32, %v1002_v30 }
 0x266   : > { %1124 = vst [vmem:[%s1961_s12 + $0xf8] sm:$0xff] %v1091_v33 }
 0x267   : > { %1656 = shalt.err (!%p1653_p10)
}
 0x268   : > { %s1712_s26 = smov 128   ;;  %s1713_s29 = smov 8  }
 0x269   : > { %1439 = dma.vmem_to_hbm [thread:$0]  (%p1829_p3), %s1139_s15, 4096, %s1141_s7, %s1126_s16, %s1712_s26, %s1712_s26, %s1713_s29  }
 0x26a PF: > { %s1155_s12 = sand.u32 1, %s1691_s18   ;;  %p2100_p12 = scmp.ge.s32.totalorder %s1703_s21, 2 }
 0x26b   : > { %s1156_s23 = scalar_lea.sflag [#allocation4], %s1155_s12 }
 0x26c   : > { %p1456_p13 = pnand %p2100_p12, %p1779_p6 }
 0x26e   : > { %p1457_p0 = pneg %p1456_p13 }
 0x270   : > { %1686 = dma.done.wait (%p1457_p0), %s1156_s23, 4096  }
 0x271   : > { %1688 = vsyncadd (%p1457_p0), %s1156_s23, 4294963200  ;;  %p20_p5 = scmp.ge.s32.totalorder %s1816_s30, 4   ;;  %s2101_s18 = smov %s1695_s19 }
 0x272   : > { %s2102_s19 = smov %s1699_s20  ;;  %s2103_s20 = smov %s1825_s9 }
 0x273   : > { %s2104_s21 = smov %s1816_s30  ;;  %22 = sbr.rel (!%p20_p5) target bundleno = 7 (0x7), region = 97 }
 0x278   :  { %1162 = vsyncpa [#allocation3], 1 }
 0x279   :  { %1164 = vsyncpa [#allocation3 + $0x1], 1 }
 0x27a   :  { %1165 = vsyncpa [#allocation6], 1 }
 0x27b   :  { %1166 = vsyncpa [#allocation9], 1 }
 0x27c   :  { %1167 = vsyncpa [#allocation4], 1 }
 0x27d   :  { %1169 = vsyncpa [#allocation4 + $0x1], 1 }

</bundles_post_ra>
